<compile_context>
chip_gen: v6e
topology: v6e:2x2x1
jax: 0.10.0
libtpu: 0.0.40
codegen_flags: <defaults>
</compile_context>

<pallas_src>
import math

import jax
import jax.numpy as jnp
from jax.experimental import pallas as pl
from jax.experimental.pallas import tpu as pltpu


_TARGET_BLOCK_BYTES = 2 * 1024 * 1024   # ~2 MiB per input block (x2 double buffering)
_INT32_MAX = 2147483647


def _cdiv(a, b):
    return -(-a // b)


def _round_up(a, m):
    return _cdiv(a, m) * m


def _compiler_params(semantics, working_set_bytes):
    kwargs = {"dimension_semantics": semantics}
    # Blocks are sized to ~2 MiB, so double buffering stays far below v5e's
    # 16 MiB scoped default; only raise the limit if a full-extent block grows.
    if working_set_bytes > 12 * (1 << 20):
        kwargs["vmem_limit_bytes"] = int(min(working_set_bytes + (8 << 20), 100 << 20))
    return pltpu.CompilerParams(**kwargs)


def _min_value(dtype):
    dtype = jnp.dtype(dtype)
    if jnp.issubdtype(dtype, jnp.floating):
        return float("-inf")
    return int(jnp.iinfo(dtype).min)


def _acc_dtype(dtype):
    dtype = jnp.dtype(dtype)
    if jnp.issubdtype(dtype, jnp.floating):
        return jnp.float32
    if jnp.issubdtype(dtype, jnp.unsignedinteger):
        return jnp.uint32
    return jnp.int32


# ---------------------------------------------------------------------------
# Path 1: reduce over a middle/leading axis (the STANet dim=1 case).
# Block (1, K, TILE_C): K on sublanes, TILE_C (>=128-multiple) on lanes.
# ---------------------------------------------------------------------------
def _argmax_sublane_kernel(x_ref, o_ref):
    x = x_ref[...]                                   # (1, K, TILE_C)
    k = x.shape[1]
    if k <= 32:
        # Short unrolled compare chain -- pure VPU, no cross-lane work.
        best_val = x[:, 0:1, :]                      # (1, 1, TILE_C)
        best_idx = jnp.zeros(best_val.shape, jnp.int32)
        for j in range(1, k):
            v = x[:, j:j + 1, :]
            upd = v > best_val                       # strict > keeps first max
            best_val = jnp.where(upd, v, best_val)
            best_idx = jnp.where(upd, j, best_idx)
        o_ref[...] = best_idx
    else:
        m = jnp.max(x, axis=1, keepdims=True)
        idx = jax.lax.broadcasted_iota(jnp.int32, x.shape, 1)
        cand = jnp.where(x == m, idx, _INT32_MAX)
        o_ref[...] = jnp.min(cand, axis=1, keepdims=True)


def _argmax_over_mid(x3):
    """x3: (pre, K, post) with post > 1 -> (pre, post) int32 argmax over K."""
    pre, k, post = x3.shape
    itemsize = jnp.dtype(x3.dtype).itemsize
    # TODO(synk): a reduction axis so large that K*128*itemsize overflows VMEM
    # would need a K-tiled carry; not needed for STANet (K = 2..4 channels).
    tile_c = max(128, (_TARGET_BLOCK_BYTES // max(1, k * itemsize)) // 128 * 128)
    if pre == 1 and post > 2 * 128:
        # keep >= 2 grid steps so dual-TensorCore chips (v7x) can split the grid
        tile_c = min(tile_c, _round_up(_cdiv(post, 2), 128))
    if tile_c >= post:
        tile_c = post                                # full extent: always legal
    grid = (pre, _cdiv(post, tile_c))
    working_set = 2 * (k * tile_c * itemsize) + 2 * (tile_c * 4)
    out = pl.pallas_call(
        _argmax_sublane_kernel,
        out_shape=jax.ShapeDtypeStruct((pre, 1, post), jnp.int32),
        grid_spec=pltpu.PrefetchScalarGridSpec(
            num_scalar_prefetch=0,
            grid=grid,
            in_specs=[pl.BlockSpec((1, k, tile_c), lambda i, j: (i, 0, j))],
            out_specs=pl.BlockSpec((1, 1, tile_c), lambda i, j: (i, 0, j)),
        ),
        compiler_params=_compiler_params(("parallel", "parallel"), working_set),
    )(x3)
    return out.reshape(pre, post)


# ---------------------------------------------------------------------------
# Path 2: reduce over the last axis.  Block (TILE_R, K), reduce over lanes.
# ---------------------------------------------------------------------------
def _argmax_lane_kernel(x_ref, o_ref):
    x = x_ref[...]                                   # (TILE_R, K)
    m = jnp.max(x, axis=-1, keepdims=True)
    idx = jax.lax.broadcasted_iota(jnp.int32, x.shape, 1)
    cand = jnp.where(x == m, idx, _INT32_MAX)
    o_ref[...] = jnp.min(cand, axis=-1)              # first max index


def _argmax_over_last(x2):
    """x2: (rows, K) -> (rows,) int32 argmax over the last axis."""
    rows, k = x2.shape
    itemsize = jnp.dtype(x2.dtype).itemsize
    tile_r = max(128, (_TARGET_BLOCK_BYTES // max(1, k * itemsize)) // 128 * 128)
    if tile_r >= rows:
        tile_r = rows                                # full extent block
    grid = (_cdiv(rows, tile_r),)
    working_set = 2 * (tile_r * k * itemsize) + 2 * (tile_r * 4)
    return pl.pallas_call(
        _argmax_lane_kernel,
        out_shape=jax.ShapeDtypeStruct((rows,), jnp.int32),
        grid_spec=pltpu.PrefetchScalarGridSpec(
            num_scalar_prefetch=0,
            grid=grid,
            in_specs=[pl.BlockSpec((tile_r, k), lambda i: (i, 0))],
            out_specs=pl.BlockSpec((tile_r,), lambda i: (i,)),
        ),
        compiler_params=_compiler_params(("parallel",), working_set),
    )(x2)


# ---------------------------------------------------------------------------
# Path 3: dim=None (global argmax).  Running (max, argmax) carried in VMEM
# scratch across the grid; never loads the whole tensor at once.
# ---------------------------------------------------------------------------
def _make_global_argmax_kernel(acc_dtype, neutral):
    def kernel(x_ref, o_ref, bv_ref, bi_ref):
        pid = pl.program_id(0)

        @pl.when(pid == 0)
        def _():
            bv_ref[...] = jnp.full(bv_ref.shape, neutral, acc_dtype)
            bi_ref[...] = jnp.zeros(bi_ref.shape, jnp.int32)

        x = x_ref[...]                               # (TILE_R, C)
        r, c = x.shape
        m = jnp.max(x, keepdims=True)                # (1, 1) block max
        row = jax.lax.broadcasted_iota(jnp.int32, x.shape, 0)
        col = jax.lax.broadcasted_iota(jnp.int32, x.shape, 1)
        flat = row * c + col
        cand = jnp.where(x == m, flat, _INT32_MAX)
        local = jnp.min(cand, keepdims=True)         # first max inside block
        gidx = pid * (r * c) + local

        mv = m.astype(acc_dtype)
        better = mv > bv_ref[...]                    # strict >: earlier block wins ties
        bv_ref[...] = jnp.where(better, mv, bv_ref[...])
        bi_ref[...] = jnp.where(better, gidx, bi_ref[...])
        o_ref[...] = bi_ref[...]

    return kernel


def _global_argmax(x):
    flat = x.reshape(-1)
    n = max(int(flat.shape[0]), 1)
    dtype = flat.dtype
    acc = _acc_dtype(dtype)
    itemsize = jnp.dtype(dtype).itemsize
    lane_c = 1024
    tile_r = max(8, min(512, ((_TARGET_BLOCK_BYTES // itemsize) // lane_c // 8) * 8))
    tile_r = min(tile_r, _round_up(_cdiv(n, lane_c), 8))
    block_elems = tile_r * lane_c
    padded = _round_up(n, block_elems)
    if padded > flat.shape[0]:
        flat = jnp.pad(flat, (0, padded - flat.shape[0]),
                       constant_values=_min_value(dtype))
    x2 = flat.reshape(padded // lane_c, lane_c)
    grid = (padded // block_elems,)
    working_set = 2 * (block_elems * itemsize)
    out = pl.pallas_call(
        _make_global_argmax_kernel(acc, _min_value(acc)),
        out_shape=jax.ShapeDtypeStruct((1, 1), jnp.int32),
        grid_spec=pltpu.PrefetchScalarGridSpec(
            num_scalar_prefetch=0,
            grid=grid,
            in_specs=[pl.BlockSpec((tile_r, lane_c), lambda i: (i, 0))],
            out_specs=pl.BlockSpec((1, 1), lambda i: (0, 0)),
            scratch_shapes=[pltpu.VMEM((1, 1), acc),
                            pltpu.VMEM((1, 1), jnp.int32)],
        ),
        compiler_params=_compiler_params(("arbitrary",), working_set),
    )(x2)
    return out[0, 0]


class ArgMax:
    """JAX/Pallas equivalent of the PyTorch ArgMax module (no parameters)."""

    def __init__(self, dim=None):
        self.dim = dim

    def __call__(self, x):
        if x.dtype == jnp.bool_:
            x = x.astype(jnp.int32)
        if self.dim is None:
            return _global_argmax(x)
        d = self.dim % x.ndim
        pre = math.prod(x.shape[:d])
        k = x.shape[d]
        post = math.prod(x.shape[d + 1:])
        out_shape = x.shape[:d] + x.shape[d + 1:]
        if post == 1:
            out = _argmax_over_last(x.reshape(pre, k))
        else:
            out = _argmax_over_mid(x.reshape(pre, k, post))
        return out.reshape(out_shape)


if __name__ == "__main__":
    key = jax.random.PRNGKey(0)
    # NCHW input like STANet's change-map logits: (batch, channels, H, W)
    x = jax.random.normal(key, (2, 4, 16, 16), dtype=jnp.float32)

    # dim=1 (channel argmax) -- the way STANet uses ArgMax; no transpose:
    # the kernel reduces over channels on sublanes, lanes stay H*W (lane-dense).
    out_c = jax.block_until_ready(ArgMax(dim=1)(x))
    ref_c = jnp.argmax(x, axis=1).astype(jnp.int32)
    assert out_c.shape == (2, 16, 16)
    assert bool(jnp.all(out_c == ref_c))

    # dim=0 (argmax over batch) -- another leading-axis case.
    out_0 = jax.block_until_ready(ArgMax(dim=0)(x))
    ref_0 = jnp.argmax(x, axis=0).astype(jnp.int32)
    assert out_0.shape == (4, 16, 16)
    assert bool(jnp.all(out_0 == ref_0))

    # dim=-1 (argmax over the last axis) -- lane-reduction path.
    out_l = jax.block_until_ready(ArgMax(dim=-1)(x))
    ref_l = jnp.argmax(x, axis=-1).astype(jnp.int32)
    assert out_l.shape == (2, 4, 16)
    assert bool(jnp.all(out_l == ref_l))

    # dim=None (global argmax over the flattened tensor) -- running-scratch path.
    out_n = jax.block_until_ready(ArgMax(dim=None)(x))
    ref_n = jnp.argmax(x).astype(jnp.int32)
    assert out_n.shape == ()
    assert int(out_n) == int(ref_n)

    print("KERNEL_OK")
</pallas_src>

<mosaic_0001>
module attributes {stable_mosaic.version = 11 : i64} {
  func.func @_argmax_sublane_kernel(%arg0: i32, %arg1: i32, %arg2: memref<1x4x256xf32, #tpu.memory_space<vmem>>, %arg3: memref<1x1x256xi32, #tpu.memory_space<vmem>>) attributes {dimension_semantics = [#tpu.dimension_semantics<parallel>, #tpu.dimension_semantics<parallel>], iteration_bounds = array<i64: 2, 1>, scalar_prefetch = 0 : i64, scratch_operands = 0 : i64, tpu.core_type = #tpu.core_type<tc>, window_params = [{transform_indices = @transform_0, window_bounds = array<i64: 1, 4, 256>}, {transform_indices = @transform_1, window_bounds = array<i64: 1, 1, 256>}]} {
    %c0 = arith.constant 0 : index
    %c0_0 = arith.constant 0 : index
    %c0_1 = arith.constant 0 : index
    %0 = vector.load %arg2[%c0, %c0_0, %c0_1] : memref<1x4x256xf32, #tpu.memory_space<vmem>>, vector<1x4x256xf32>
    %1 = vector.extract_strided_slice %0 {offsets = [0, 0, 0], sizes = [1, 1, 256], strides = [1, 1, 1]} : vector<1x4x256xf32> to vector<1x1x256xf32>
    %c0_i32 = arith.constant 0 : i32
    %2 = vector.broadcast %c0_i32 : i32 to vector<1x1x256xi32>
    %3 = vector.extract_strided_slice %0 {offsets = [0, 1, 0], sizes = [1, 1, 256], strides = [1, 1, 1]} : vector<1x4x256xf32> to vector<1x1x256xf32>
    %4 = arith.cmpf ogt, %3, %1 : vector<1x1x256xf32>
    %5 = arith.select %4, %3, %1 : vector<1x1x256xi1>, vector<1x1x256xf32>
    %c1_i32 = arith.constant 1 : i32
    %6 = vector.broadcast %c1_i32 : i32 to vector<1x1x256xi32>
    %7 = arith.select %4, %6, %2 : vector<1x1x256xi1>, vector<1x1x256xi32>
    %8 = vector.extract_strided_slice %0 {offsets = [0, 2, 0], sizes = [1, 1, 256], strides = [1, 1, 1]} : vector<1x4x256xf32> to vector<1x1x256xf32>
    %9 = arith.cmpf ogt, %8, %5 : vector<1x1x256xf32>
    %10 = arith.select %9, %8, %5 : vector<1x1x256xi1>, vector<1x1x256xf32>
    %c2_i32 = arith.constant 2 : i32
    %11 = vector.broadcast %c2_i32 : i32 to vector<1x1x256xi32>
    %12 = arith.select %9, %11, %7 : vector<1x1x256xi1>, vector<1x1x256xi32>
    %13 = vector.extract_strided_slice %0 {offsets = [0, 3, 0], sizes = [1, 1, 256], strides = [1, 1, 1]} : vector<1x4x256xf32> to vector<1x1x256xf32>
    %14 = arith.cmpf ogt, %13, %10 : vector<1x1x256xf32>
    %c3_i32 = arith.constant 3 : i32
    %15 = vector.broadcast %c3_i32 : i32 to vector<1x1x256xi32>
    %16 = arith.select %14, %15, %12 : vector<1x1x256xi1>, vector<1x1x256xi32>
    %c0_2 = arith.constant 0 : index
    %c0_3 = arith.constant 0 : index
    %c0_4 = arith.constant 0 : index
    %17 = vector.load %arg3[%c0_2, %c0_3, %c0_4] : memref<1x1x256xi32, #tpu.memory_space<vmem>>, vector<1x1x256xi32>
    tpu.vector_store %arg3[%c0_2, %c0_3, %c0_4], %16 {strides = array<i32>} : memref<1x1x256xi32, #tpu.memory_space<vmem>>, vector<1x1x256xi32>,
    return
  }
  func.func @transform_0(%arg0: i32, %arg1: i32) -> (i32, i32, i32) {
    %c0_i32 = arith.constant 0 : i32
    %c0_i32_0 = arith.constant 0 : i32
    return %arg0, %c0_i32, %arg1 : i32, i32, i32
  }
  func.func @transform_1(%arg0: i32, %arg1: i32) -> (i32, i32, i32) {
    %c0_i32 = arith.constant 0 : i32
    %c0_i32_0 = arith.constant 0 : i32
    return %arg0, %c0_i32, %arg1 : i32, i32, i32
  }
}

</mosaic_0001>

<bundles_post_ra>
// kernel: tpu_custom_call.1
= control target key start
LH: loop header
LB: loop body
LE: loop exit
PB: predicated region body
PF: predicated region fallthrough
CT: control target
= control target key end

     0   :  { %6 = vsyncpa [#allocation3], 0  ;;  %s635_s0 = inlined_call_operand.hbm [shape: f32[2,4,256], index: 0, kind: input, shape index: {}]   ;;  %s636_s1 = inlined_call_operand.hbm [shape: s32[2,1,256], index: 1, kind: output, shape index: {}]  }
   0x1   :  { %8 = vsyncpa [#allocation3 + $0x1], 0 }
   0x2   :  { %9 = vsyncpa [#allocation4], 0 }
   0x3   :  { %11 = vsyncpa [#allocation4 + $0x1], 0  ;;  %s500_s6 = smov 0   ;;  %s502_s7 = smov 0  }
   0x4   :  { %s504_s8 = smov 0   ;;  %s506_s9 = smov 0  }
   0x5   :  { %s508_s10 = smov 0   ;;  %s510_s11 = smov 0  }
   0x6 LB: > { %s295_s12 = sadd.s32 4294967295, %s484_s11   ;;  %s296_s13 = sadd.s32 4294967294, %s484_s11   ;;  %s484_s11 = sphi %s510_s11, %s17_s11   ;;  %s480_s10 = sphi %s508_s10, %s648_s10   ;;  %s476_s9 = sphi %s506_s9, %s647_s9   ;;  %s472_s8 = sphi %s504_s8, %s646_s8   ;;  %s468_s7 = sphi %s502_s7, %s645_s7   ;;  %s464_s6 = sphi %s500_s6, %s644_s6  }
   0x7   : > { %s29_s14 = sadd.s32 1, %s480_s10  ;;  %s38_s15 = sadd.s32 1, %s472_s8 }
   0x8   : > { %p31_p0 = scmp.ge.s32.totalorder %s29_s14, 2  ;;  %p45_p1 = scmp.ne.s32.totalorder %s472_s8, %s468_s7 }
   0x9   : > { %p46_p2 = scmp.eq.s32.totalorder %s484_s11, 0  ;;  %p51_p3 = scmp.ne.s32.totalorder %s468_s7, %s464_s6 }
   0xa   : > { %s650_s14 = smov (%p31_p0, %s29_s14), 0  ;;  %p52_p5 = scmp.eq.s32.totalorder %s295_s12, 0 }
   0xb   : > { %p541_p4 = por %p46_p2, %p45_p1  ;;  %s33_s17 = ssub.s32 %s480_s10, %s650_s14 }
   0xc   : > { %p77_p6 = scmp.eq.s32.totalorder %s295_s12, 1  ;;  %p36_p7 = scmp.eq.s32.totalorder %s33_s17, 0 }
   0xd   : > { %p547_p8 = por %p52_p5, %p51_p3  ;;  %p83_p10 = scmp.eq.s32.totalorder %s296_s13, 1 }
   0xe   : > { %p551_p9 = por %p77_p6, %p45_p1  ;;  %p324_p13 = scmp.lt.s32.totalorder %s484_s11, 2 }
   0xf   : > { %s556_s20 = scalar_select %p36_p7, %s472_s8, %s38_s15  }
  0x10   : > { %p558_p11 = por %p83_p10, %p51_p3  ;;  %s103_s22 = sand.u32 1, %s472_s8  }
  0x11   : > { %s299_s23 = sshll.u32 %s103_s22, 3  ;;  %s310_s24 = sshll.u32 %s480_s10, 7 }
  0x12   : > { %s640_s21 = scalar_select %p558_p11, 1, 0 }
  0x13   : > { %s115_s27 = scalar_lea.hbm %s635_s0, %s310_s24  ;;  %s107_s28 = scalar_lea.vmem [#allocation2], %s299_s23 }
  0x14   : > { %s117_s29 = sshll.u32 %s107_s28, 4  ;;  %p571_p0 = pnand %p324_p13, %p541_p4  ;;  %s118_s29 = int_to_ptr.vmem [resolvable:$true] %s117_s29 }
  0x15   : > { %p302_p1 = scmp.ge.s32.totalorder %s484_s11, 1  ;;  %p122_p2 = scmp.lt.s32.totalorder %s484_s11, 3 }
  0x16   : > { %s104_s2 = scalar_lea.sflag [#allocation3], %s103_s22  ;;  %p378_p3 = pneg %p571_p0 }
  0x17   : > { %s389_s3 = scalar_lea.vmem %s118_s29, 128  ;;  %s486_s4 = smov [#allocation2]  }
  0x18   : > { %p390_p5 = scmp.ne.s32.totalorder %s118_s29, %s389_s3  ;;  %s394_s5 = sshll.u32 %s486_s4, 4  ;;  %s395_s5 = int_to_ptr.vmem [resolvable:$false] %s394_s5 }
  0x19   : > { %s396_s12 = scalar_lea.vmem %s395_s5, 256  ;;  %p397_p10 = scmp.lt.s32.totalorder %s118_s29, %s395_s5 }
  0x1a   : > { %p392_p6 = pnand %p390_p5, %p378_p3  ;;  %p398_p12 = scmp.lt.s32.totalorder %s396_s12, %s389_s3 }
  0x1c   : > { %p393_p7 = pneg %p392_p6  ;;  %p399_p4 = por %p398_p12, %p397_p10 }
  0x1e   : > { %p400_p13 = pnand %p399_p4, %p393_p7 }
  0x20   : > { %403 = shalt.err (!%p400_p13)
}
  0x21   : > { %319 = dma.hbm_to_vmem [thread:$0]  (!%p571_p0), %s115_s27, 128, %s118_s29, %s104_s2  }
  0x22   : > { %p123_p11 = pnand %p302_p1, %p122_p2 }
  0x23   : > { %s586_s13 = sand.u32 (!%p123_p11), 1, %s468_s7  }
  0x24   : > { %126 = sbr.rel (%p123_p11) target bundleno = 76 (0x4c), region = 24  ;;  %s303_s15 = sshll.u32 (!%p123_p11), %s586_s13, 3 }
  0x25   : > { %s129_s16 = scalar_lea.sflag (!%p123_p11), [#allocation3], %s586_s13  ;;  %s132_s17 = scalar_lea.vmem (!%p123_p11), [#allocation2], %s303_s15 }
  0x29   : > { %455 = dma.done.wait (%p547_p8), %s129_s16, 128  }
  0x2a   : > { %457 = vsyncadd (%p547_p8), %s129_s16, 4294967168  ;;  %v153_v0 = vld [vmem:[%s132_s17] sm:$0xff]  ;;  %v487_v2 = vmov 1966171168   ;;  %v176_v4 = vlaneseq  ;;  %v488_v6 = vmov 0   ;;  %s304_s18 = sshll.u32 %s586_s13, 1 }
  0x2b   : > { %v155_v1 = vrot.slane %v153_v0, 7  ;;  %v174_v3 = vunpack.c.l.s4 %v487_v2  ;;  %s150_s22 = scalar_lea.vmem [#allocation5], %s304_s18  ;;  %s311_s24 = sshll.u32 %s476_s9, 5 }
  0x2c   : > { %v177_v11 = vshrl.u32 %v176_v4, 7  ;;  %s211_s23 = sshll.u32 %s150_s22, 4  ;;  %vm191_vm3 = vcmp.lt.s32.totalorder %v176_v4, 256  ;;  %s209_s27 = scalar_lea.hbm %s636_s1, %s311_s24  ;;  %s212_s23 = int_to_ptr.vmem [resolvable:$true] %s211_s23 }
  0x2d   : > { %vm157_vm0 = vcmp.gt.f32.partialorder %v153_v0, %v155_v1  ;;  %v175_v10 = vunpack.c.0.s8 %v174_v3  ;;  %s195_s28 = scalar_lea.sflag [#allocation4], %s586_s13  ;;  %s404_s29 = scalar_lea.vmem %s212_s23, 32 }
  0x2e   : > { %v158_v5 = vsel %vm157_vm0, %v153_v0, %v155_v1  ;;  %v159_v7 = vsel %vm157_vm0, 1, %v488_v6  ;;  %p405_p8 = scmp.ne.s32.totalorder %s212_s23, %s404_s29  ;;  %s489_s30 = smov [#allocation5]  }
  0x2f   : > { %v161_v8 = vrot.slane %v158_v5, 7  ;;  %v165_v9 = vrot.slane %v159_v7, 7  ;;  %v178_v16 = vsub.s32 %v175_v10, %v177_v11  ;;  %s408_s2 = sshll.u32 %s489_s30, 4  ;;  %s409_s2 = int_to_ptr.vmem [resolvable:$false] %s408_s2 }
  0x30   : > { %p406_p11 = pnand %p405_p8, %p551_p9  ;;  %s410_s3 = scalar_lea.vmem %s409_s2, 64 }
  0x31   : > { %vm163_vm1 = vcmp.gt.f32.partialorder %v153_v0, %v161_v8  ;;  %p411_p0 = scmp.lt.s32.totalorder %s212_s23, %s409_s2  ;;  %p412_p1 = scmp.lt.s32.totalorder %s410_s3, %s404_s29 }
  0x32   : > { %v164_v12 = vsel %vm163_vm1, %v153_v0, %v161_v8  ;;  %v166_v13 = vsel %vm163_vm1, 2, %v165_v9  ;;  %p407_p12 = pneg %p406_p11 }
  0x33   : > { %v168_v14 = vrot.slane %v164_v12, 7  ;;  %v171_v15 = vrot.slane %v166_v13, 7  ;;  %p413_p2 = por %p412_p1, %p411_p0 }
  0x35   : > { %vm170_vm2 = vcmp.gt.f32.partialorder %v153_v0, %v168_v14  ;;  %p414_p3 = pnand %p413_p2, %p407_p12 }
  0x36   : > { %v172_v17 = vsel %vm170_vm2, 3, %v171_v15 }
  0x37   : > { %v179_v18 = vrot.slane %v172_v17, %v178_v16 }
  0x39   : > { %v180_v19 = vcombine.high %v179_v18, %v179_v18 }
  0x3b   : > { %v187_v20 = vrot.slane %v180_v19, %v178_v16 }
  0x3d   : > { %v188_v21 = vcombine.high %v187_v20, %v187_v20 }
  0x3f   : > { %193 = vst.msk [vmem:[%s150_s22] sm:$0x3] %vm191_vm3, %v188_v21 }
  0x40   : > { %417 = shalt.err (!%p414_p3)
}
  0x41   : > { %s418_s9 = scalar_lea.hbm %s209_s27, 32  ;;  %s422_s12 = scalar_lea.hbm %s636_s1, 64 }
  0x42   : > { %p419_p5 = scmp.ne.s32.totalorder %s209_s27, %s418_s9  ;;  %p423_p10 = scmp.lt.s32.totalorder %s209_s27, %s636_s1 }
  0x43   : > { %p424_p4 = scmp.lt.s32.totalorder %s422_s12, %s418_s9 }
  0x44   : > { %p420_p6 = pnand %p419_p5, %p551_p9 }
  0x45   : > { %p425_p13 = por %p424_p4, %p423_p10 }
  0x46   : > { %p421_p7 = pneg %p420_p6 }
  0x48   : > { %p426_p8 = pnand %p425_p13, %p421_p7 }
  0x4a   : > { %429 = shalt.err (!%p426_p8)
}
  0x4b   : > { %314 = dma.vmem_to_hbm [thread:$0]  (%p551_p9), %s212_s23, 32, %s209_s27, %s195_s28  }
  0x4c PF: > { %s223_s16 = sand.u32 1, %s464_s6   ;;  %p642_p11 = scmp.ne.s32.totalorder %s640_s21, 0 }
  0x4d   : > { %p643_p12 = scmp.ge.s32.totalorder %s484_s11, 2  ;;  %s224_s17 = scalar_lea.sflag [#allocation4], %s223_s16 }
  0x4f   : > { %p321_p0 = pnand %p643_p12, %p642_p11 }
  0x51   : > { %p322_p1 = pneg %p321_p0 }
  0x53   : > { %459 = dma.done.wait (%p322_p1), %s224_s17, 32  }
  0x54   : > { %461 = vsyncadd (%p322_p1), %s224_s17, 4294967264  ;;  %s17_s11 = sadd.s32 1, %s484_s11   ;;  %s644_s6 = smov %s468_s7 }
  0x55   : > { %p14_p2 = scmp.ge.s32.totalorder %s17_s11, 4   ;;  %s645_s7 = smov %s472_s8 }
  0x56   : > { %s646_s8 = smov %s556_s20  ;;  %s647_s9 = smov %s480_s10 }
  0x57   : > { %s648_s10 = smov %s650_s14  ;;  %16 = sbr.rel (!%p14_p2) target bundleno = 6 (0x6), region = 69 }
  0x5c   :  { %229 = vsyncpa [#allocation3], 1 }
  0x5d   :  { %231 = vsyncpa [#allocation3 + $0x1], 1 }
  0x5e   :  { %232 = vsyncpa [#allocation4], 1 }
  0x5f   :  { %234 = vsyncpa [#allocation4 + $0x1], 1 }

</bundles_post_ra>
